<compile_context>
chip_gen: v7x
topology: tpu7x:2x2x1
jax: 0.10.0
libtpu: 0.0.40
codegen_flags: <defaults>
</compile_context>

<pallas_src>
import functools

import jax
import jax.numpy as jnp
from jax import lax
from jax.experimental import pallas as pl
from jax.experimental.pallas import tpu as pltpu

EFS = 1e-10
BN_EPS = 1e-5


# ----------------------------------------------------------------------------
# 1x1 conv (matmul over channels) fused with BN scale/bias and optional ReLU
# ----------------------------------------------------------------------------
def _pointwise_kernel(x_ref, w_ref, s_ref, b_ref, o_ref, *, relu):
    y = jnp.dot(x_ref[...], w_ref[...], preferred_element_type=jnp.float32)
    y = y * s_ref[...] + b_ref[...]
    if relu:
        y = jnp.maximum(y, 0.0)
    o_ref[...] = y.astype(o_ref.dtype)


def pointwise_conv(x2d, w, scale, bias, *, relu, tm=512):
    """x2d: (M, Cin) f32; w: (Cin, Cout) f32 -> (M, Cout) f32."""
    M, Cin = x2d.shape
    Cout = w.shape[1]
    tm = min(tm, M)
    Mp = ((M + tm - 1) // tm) * tm            # pad the row tail, no assert
    xb = x2d.astype(jnp.bfloat16)
    if Mp != M:
        xb = jnp.pad(xb, ((0, Mp - M), (0, 0)))
    wb = w.astype(jnp.bfloat16)
    kernel = functools.partial(_pointwise_kernel, relu=relu)
    out = pl.pallas_call(
        kernel,
        out_shape=jax.ShapeDtypeStruct((Mp, Cout), jnp.float32),
        grid=(Mp // tm,),
        in_specs=[
            pl.BlockSpec((tm, Cin), lambda i: (i, 0)),
            pl.BlockSpec((Cin, Cout), lambda i: (0, 0)),
            pl.BlockSpec((1, Cout), lambda i: (0, 0)),
            pl.BlockSpec((1, Cout), lambda i: (0, 0)),
        ],
        out_specs=pl.BlockSpec((tm, Cout), lambda i: (i, 0)),
        compiler_params=pltpu.CompilerParams(
            dimension_semantics=("parallel",)),
        cost_estimate=pl.CostEstimate(
            flops=2 * Mp * Cin * Cout, transcendentals=0,
            bytes_accessed=Mp * Cin * 2 + Cin * Cout * 2 + Mp * Cout * 4),
    )(xb, wb, scale.reshape(1, Cout), bias.reshape(1, Cout))
    return out[:M]


# ----------------------------------------------------------------------------
# Dilated 3x3 conv: Cin-tiled reduction grid axis + VMEM f32 accumulator,
# fused BN scale/bias + ReLU epilogue.
# ----------------------------------------------------------------------------
def _dilated3x3_kernel(xp_ref, w_ref, s_ref, b_ref, o_ref, acc_ref,
                       *, H, W, d, relu, fuse_taps):
    c = pl.program_id(1)

    @pl.when(c == 0)
    def _init():
        acc_ref[...] = jnp.zeros_like(acc_ref)

    xp = xp_ref[0]                                  # (Hp, Wp, tc) bf16
    tc = xp.shape[-1]
    if fuse_taps:
        # Lane-aligned tc (production): one (H*W, 9*tc) im2col block and a
        # single MXU contraction with K = 9*tc.
        cols = [xp[ky * d:ky * d + H, kx * d:kx * d + W, :].reshape(H * W, tc)
                for ky in range(3) for kx in range(3)]
        im2col = jnp.concatenate(cols, axis=-1)     # (H*W, 9*tc)
        w = w_ref[0].reshape(9 * tc, -1)            # (9*tc, Cout)
        acc_ref[...] += jnp.dot(im2col, w, preferred_element_type=jnp.float32)
    else:
        # Narrow-channel fallback (toy config): 9 per-tap dots, accumulated
        # locally in f32, single scratch update.
        acc = jnp.zeros(acc_ref.shape, jnp.float32)
        for t in range(9):
            ky, kx = divmod(t, 3)
            patch = xp[ky * d:ky * d + H, kx * d:kx * d + W, :]
            acc = acc + jnp.dot(patch.reshape(H * W, tc), w_ref[0, t],
                                preferred_element_type=jnp.float32)
        acc_ref[...] += acc

    @pl.when(c == pl.num_programs(1) - 1)
    def _finalize():
        y = acc_ref[...] * s_ref[...] + b_ref[...]
        if relu:
            y = jnp.maximum(y, 0.0)
        o_ref[...] = y.reshape(1, H, W, -1).astype(o_ref.dtype)


def dilated_conv3x3(x_nhwc, w9, scale, bias, *, dilation, relu, tc_max=256):
    """x_nhwc: (N,H,W,Cin) f32; w9: (9,Cin,Cout) f32.  'same' pad = dilation."""
    N, H, W, Cin = x_nhwc.shape
    Cout = w9.shape[-1]
    d = dilation
    tc = tc_max if (Cin % tc_max == 0) else Cin     # Cin reduction tile
    nct = Cin // tc
    fuse_taps = (tc % 128 == 0)
    xp = jnp.pad(x_nhwc, ((0, 0), (d, d), (d, d), (0, 0))).astype(jnp.bfloat16)
    Hp, Wp = H + 2 * d, W + 2 * d
    # (9, Cin, Cout) -> (nct, 9, tc, Cout): taps grouped per Cin tile
    wr = w9.reshape(9, nct, tc, Cout).transpose(1, 0, 2, 3).astype(jnp.bfloat16)
    kernel = functools.partial(_dilated3x3_kernel, H=H, W=W, d=d, relu=relu,
                               fuse_taps=fuse_taps)
    return pl.pallas_call(
        kernel,
        out_shape=jax.ShapeDtypeStruct((N, H, W, Cout), jnp.float32),
        grid=(N, nct),
        in_specs=[
            pl.BlockSpec((1, Hp, Wp, tc), lambda n, c: (n, 0, 0, c)),
            pl.BlockSpec((1, 9, tc, Cout), lambda n, c: (c, 0, 0, 0)),
            pl.BlockSpec((1, Cout), lambda n, c: (0, 0)),
            pl.BlockSpec((1, Cout), lambda n, c: (0, 0)),
        ],
        out_specs=pl.BlockSpec((1, H, W, Cout), lambda n, c: (n, 0, 0, 0)),
        scratch_shapes=[pltpu.VMEM((H * W, Cout), jnp.float32)],
        compiler_params=pltpu.CompilerParams(
            dimension_semantics=("parallel", "arbitrary")),
        cost_estimate=pl.CostEstimate(
            flops=2 * N * H * W * 9 * Cin * Cout, transcendentals=0,
            bytes_accessed=N * Hp * Wp * Cin * 2 + 9 * Cin * Cout * 2
            + N * H * W * Cout * 4),
    )(xp, wr, scale.reshape(1, Cout), bias.reshape(1, Cout))


# ----------------------------------------------------------------------------
# Fused concat(x1..x5) + conv1 + bn1 + ReLU (no HBM concat round-trip)
# ----------------------------------------------------------------------------
def _concat_conv1_kernel(x1_ref, x2_ref, x3_ref, x4_ref, x5t_ref,
                         w_ref, s_ref, b_ref, o_ref):
    acc = jnp.dot(x1_ref[0], w_ref[0], preferred_element_type=jnp.float32)
    acc = acc + jnp.dot(x2_ref[0], w_ref[1], preferred_element_type=jnp.float32)
    acc = acc + jnp.dot(x3_ref[0], w_ref[2], preferred_element_type=jnp.float32)
    acc = acc + jnp.dot(x4_ref[0], w_ref[3], preferred_element_type=jnp.float32)
    acc = acc + x5t_ref[0]              # gap-branch (1, P) term, broadcast rows
    y = jnp.maximum(acc * s_ref[...] + b_ref[...], 0.0)
    o_ref[...] = y[None].astype(o_ref.dtype)


def fused_concat_conv1(x1, x2, x3, x4, x5_term, w4, scale, bias, *, t_rows=512):
    """x1..x4: (N, HW, P) f32; x5_term: (N, P) f32 (already x5 @ W_branch5);
    w4: (4, P, P).  Computes relu(bn1(conv1(concat(x1..x5))))."""
    N, HW, P = x1.shape
    t = min(t_rows, HW)
    HWp = ((HW + t - 1) // t) * t

    def prep(a):
        a = a.astype(jnp.bfloat16)
        if HWp != HW:
            a = jnp.pad(a, ((0, 0), (0, HWp - HW), (0, 0)))
        return a

    xs = [prep(a) for a in (x1, x2, x3, x4)]
    out = pl.pallas_call(
        _concat_conv1_kernel,
        out_shape=jax.ShapeDtypeStruct((N, HWp, P), jnp.float32),
        grid=(N, HWp // t),
        in_specs=[pl.BlockSpec((1, t, P), lambda n, i: (n, i, 0))] * 4 + [
            pl.BlockSpec((1, 1, P), lambda n, i: (n, 0, 0)),
            pl.BlockSpec((4, P, P), lambda n, i: (0, 0, 0)),
            pl.BlockSpec((1, P), lambda n, i: (0, 0)),
            pl.BlockSpec((1, P), lambda n, i: (0, 0)),
        ],
        out_specs=pl.BlockSpec((1, t, P), lambda n, i: (n, i, 0)),
        compiler_params=pltpu.CompilerParams(
            dimension_semantics=("parallel", "parallel")),
        cost_estimate=pl.CostEstimate(
            flops=2 * N * HWp * 4 * P * P, transcendentals=0,
            bytes_accessed=4 * N * HWp * P * 2 + 4 * P * P * 2
            + N * HWp * P * 4),
    )(xs[0], xs[1], xs[2], xs[3], x5_term.reshape(N, 1, P),
      w4.astype(jnp.bfloat16), scale.reshape(1, P), bias.reshape(1, P))
    return out[:, :HW, :]


# ----------------------------------------------------------------------------
# Mask ("gt") branch helpers: single-channel all-ones convs == box sums.
# Done in plain JAX — 1-lane Pallas outputs would waste 127/128 of every vreg
# for negligible work (see review).
# ----------------------------------------------------------------------------
def _norm_max(a):
    # torch.max(x) with no dim == global max over all elements (incl. batch)
    return a / (jnp.max(a) + EFS)


def _box9_sum(m_nhwc, d):
    N, H, W, _ = m_nhwc.shape
    mp = jnp.pad(m_nhwc, ((0, 0), (d, d), (d, d), (0, 0)))
    acc = jnp.zeros_like(m_nhwc)
    for ky in range(3):
        for kx in range(3):
            acc = acc + mp[:, ky * d:ky * d + H, kx * d:kx * d + W, :]
    return acc


# ----------------------------------------------------------------------------
# Parameter construction (deterministic, synthetic; BN in eval mode)
# ----------------------------------------------------------------------------
def bn_scale_bias(cout):
    gamma = jnp.ones((cout,), jnp.float32)
    beta = jnp.zeros((cout,), jnp.float32)
    rmean = jnp.zeros((cout,), jnp.float32)
    rvar = jnp.ones((cout,), jnp.float32)
    scale = gamma / jnp.sqrt(rvar + BN_EPS)
    bias = beta - rmean * scale
    return scale, bias


def make_params(key, inplanes, planes):
    ks = jax.random.split(key, 6)

    def kaiming(k, shape, fan_in):
        return jax.random.normal(k, shape, jnp.float32) * jnp.sqrt(2.0 / fan_in)

    p = {}
    p["w_aspp1"] = kaiming(ks[0], (inplanes, planes), inplanes)
    p["w_aspp2"] = kaiming(ks[1], (9, inplanes, planes), inplanes * 9)
    p["w_aspp3"] = kaiming(ks[2], (9, inplanes, planes), inplanes * 9)
    p["w_aspp4"] = kaiming(ks[3], (9, inplanes, planes), inplanes * 9)
    p["w_gap"] = kaiming(ks[4], (inplanes, planes), inplanes)
    # conv1 (1x1 over the 5-branch concat), stored as (5, planes, planes) blocks
    p["w_conv1"] = kaiming(ks[5], (5, planes, planes), 5 * planes)
    for name in ("aspp1", "aspp2", "aspp3", "aspp4", "gap", "bn1"):
        p[f"s_{name}"], p[f"b_{name}"] = bn_scale_bias(planes)
    return p


# ----------------------------------------------------------------------------
# Forward pass (ASPP_bcl_att2.forward, uncertainty branches disabled)
# ----------------------------------------------------------------------------
def aspp_bcl_att2_forward(params, x_nchw, mask_nchw, *, dilations=(1, 6, 12, 18)):
    p = params
    N, Cin, H, W = x_nchw.shape
    planes = p["w_aspp1"].shape[1]
    HW = H * W

    # TODO(synk): the NCHW public interface forces these layout transposes; an
    #             NHWC module boundary would remove this pure-HBM-traffic glue.
    x = jnp.transpose(x_nchw, (0, 2, 3, 1))         # NHWC
    mask = jnp.transpose(mask_nchw, (0, 2, 3, 1))   # NHWC, C=1
    x2d = x.reshape(N * HW, Cin)

    # ---- image branches ------------------------------------------------------
    x1 = pointwise_conv(x2d, p["w_aspp1"], p["s_aspp1"], p["b_aspp1"],
                        relu=True).reshape(N, H, W, planes)
    x2 = dilated_conv3x3(x, p["w_aspp2"], p["s_aspp2"], p["b_aspp2"],
                         dilation=dilations[1], relu=True)
    x3 = dilated_conv3x3(x, p["w_aspp3"], p["s_aspp3"], p["b_aspp3"],
                         dilation=dilations[2], relu=True)
    x4 = dilated_conv3x3(x, p["w_aspp4"], p["s_aspp4"], p["b_aspp4"],
                         dilation=dilations[3], relu=True)

    pooled = jnp.mean(x, axis=(1, 2))                # (N, Cin)
    x5_flat = pointwise_conv(pooled, p["w_gap"], p["s_gap"], p["b_gap"],
                             relu=True)              # (N, planes)

    # ---- fused concat + conv1 + bn1 + relu -----------------------------------
    # gap branch is constant over space: precompute its per-batch conv1 term
    x5_term = jnp.dot(x5_flat.astype(jnp.bfloat16),
                      p["w_conv1"][4].astype(jnp.bfloat16),
                      preferred_element_type=jnp.float32)
    x_ = fused_concat_conv1(x1.reshape(N, HW, planes),
                            x2.reshape(N, HW, planes),
                            x3.reshape(N, HW, planes),
                            x4.reshape(N, HW, planes),
                            x5_term, p["w_conv1"][:4],
                            p["s_bn1"], p["b_bn1"]).reshape(N, H, W, planes)
    x_drop = x_                                      # Dropout(0.5), eval mode

    # ---- mask ("gt") branches, fea_weight_choice == 'max' --------------------
    x1_mask = _norm_max(mask)                                   # 1x1, weight=1
    x2_mask = _norm_max(_box9_sum(mask, dilations[1]))
    x3_mask = _norm_max(_box9_sum(mask, dilations[2]))
    x4_mask = _norm_max(_box9_sum(mask, dilations[3]))
    x5__mask = _norm_max(jnp.mean(mask, axis=(1, 2)))           # (N, 1)
    x5_mask = jnp.broadcast_to(x5__mask[:, None, None, :], (N, H, W, 1))
    # conv1gt (1x1, all-ones over 5 channels) == channel sum
    x__mask = x1_mask + x2_mask + x3_mask + x4_mask + x5_mask
    mask_out = _norm_max(x__mask)

    # ---- back to NCHW (PyTorch convention) -----------------------------------
    def to_nchw(a):
        return jnp.transpose(a, (0, 3, 1, 2))

    feats = [to_nchw(x1), to_nchw(x2), to_nchw(x3), to_nchw(x4),
             x5_flat[:, :, None, None],              # x5_: (N, planes, 1, 1)
             to_nchw(x_)]
    mask_feats = [to_nchw(x1_mask), to_nchw(x2_mask), to_nchw(x3_mask),
                  to_nchw(x4_mask),
                  x5__mask[:, :, None, None],        # (N, 1, 1, 1)
                  to_nchw(x__mask)]
    return (feats, mask_feats, to_nchw(x_drop), to_nchw(mask_out), [], [])


# ----------------------------------------------------------------------------
# Main
# ----------------------------------------------------------------------------
if __name__ == "__main__":
    # Small, module-consistent shapes (stand-in for inplanes=2048, planes=256,
    # output_stride=16 -> dilations [1, 6, 12, 18]).
    N, INPLANES, PLANES, H, W = 2, 8, 32, 16, 16
    key = jax.random.PRNGKey(0)
    kx, km, kp = jax.random.split(key, 3)

    x = jax.random.normal(kx, (N, INPLANES, H, W), jnp.float32)
    mask = (jax.random.uniform(km, (N, 1, H, W), jnp.float32) > 0.5
            ).astype(jnp.float32)
    params = make_params(kp, INPLANES, PLANES)

    out = aspp_bcl_att2_forward(params, x, mask)
    jax.block_until_ready(out)

    # ---- light correctness checks vs XLA / jnp references --------------------
    x_nhwc = jnp.transpose(x, (0, 2, 3, 1))
    xb = x_nhwc.astype(jnp.bfloat16)

    # aspp1 (pointwise kernel)
    ref1 = jnp.dot(xb.reshape(-1, INPLANES),
                   params["w_aspp1"].astype(jnp.bfloat16),
                   preferred_element_type=jnp.float32)
    ref1 = jnp.maximum(ref1 * params["s_aspp1"] + params["b_aspp1"], 0.0)
    got1 = jnp.transpose(out[0][0], (0, 2, 3, 1)).reshape(-1, PLANES)
    assert jnp.allclose(ref1, got1, atol=2e-2, rtol=2e-2), "aspp1 mismatch"

    # aspp2 (dilated-conv kernel) vs XLA dilated conv with bf16 operands
    d = 6
    w_hwio = params["w_aspp2"].reshape(3, 3, INPLANES, PLANES
                                       ).astype(jnp.bfloat16)
    ref2 = lax.conv_general_dilated(
        xb, w_hwio, window_strides=(1, 1), padding=[(d, d), (d, d)],
        rhs_dilation=(d, d), dimension_numbers=("NHWC", "HWIO", "NHWC"),
        preferred_element_type=jnp.float32)
    ref2 = jnp.maximum(ref2 * params["s_aspp2"] + params["b_aspp2"], 0.0)
    got2 = jnp.transpose(out[0][1], (0, 2, 3, 1))
    assert jnp.allclose(ref2, got2, atol=2e-2, rtol=2e-2), "dilated conv mismatch"

    # fused concat + conv1 + bn1 + relu vs explicit concat matmul
    x1n, x2n, x3n, x4n = [jnp.transpose(t, (0, 2, 3, 1)) for t in out[0][:4]]
    x5f = out[0][4][:, :, 0, 0]
    x5b = jnp.broadcast_to(x5f[:, None, None, :], x1n.shape)
    cat = jnp.concatenate([x1n, x2n, x3n, x4n, x5b], axis=-1)
    refc = jnp.dot(cat.reshape(-1, 5 * PLANES).astype(jnp.bfloat16),
                   params["w_conv1"].reshape(5 * PLANES, PLANES
                                             ).astype(jnp.bfloat16),
                   preferred_element_type=jnp.float32)
    refc = jnp.maximum(refc * params["s_bn1"] + params["b_bn1"], 0.0)
    gotc = jnp.transpose(out[2], (0, 2, 3, 1)).reshape(-1, PLANES)
    assert jnp.allclose(refc, gotc, atol=2e-2, rtol=2e-2), "conv1 fusion mismatch"

    print("KERNEL_OK")
</pallas_src>

<mosaic_0001>
module attributes {stable_mosaic.version = 11 : i64} {
  func.func @_pointwise_kernel(%arg0: i32, %arg1: memref<512x8xbf16, #tpu.memory_space<vmem>>, %arg2: memref<8x32xbf16, #tpu.memory_space<vmem>>, %arg3: memref<1x32xf32, #tpu.memory_space<vmem>>, %arg4: memref<1x32xf32, #tpu.memory_space<vmem>>, %arg5: memref<512x32xf32, #tpu.memory_space<vmem>>) attributes {dimension_semantics = [#tpu.dimension_semantics<parallel>], iteration_bounds = array<i64: 1>, scalar_prefetch = 0 : i64, scratch_operands = 0 : i64, tpu.core_type = #tpu.core_type<tc>, window_params = [{transform_indices = @transform_0, window_bounds = array<i64: 512, 8>}, {pipeline_mode = #tpu.pipeline_mode<synchronous>, transform_indices = @transform_1, window_bounds = array<i64: 8, 32>}, {pipeline_mode = #tpu.pipeline_mode<synchronous>, transform_indices = @transform_2, window_bounds = array<i64: 1, 32>}, {pipeline_mode = #tpu.pipeline_mode<synchronous>, transform_indices = @transform_3, window_bounds = array<i64: 1, 32>}, {transform_indices = @transform_4, window_bounds = array<i64: 512, 32>}]} {
    %c0 = arith.constant 0 : index
    %c0_0 = arith.constant 0 : index
    %0 = vector.load %arg1[%c0, %c0_0] : memref<512x8xbf16, #tpu.memory_space<vmem>>, vector<512x8xbf16>
    %c0_1 = arith.constant 0 : index
    %c0_2 = arith.constant 0 : index
    %1 = vector.load %arg2[%c0_1, %c0_2] : memref<8x32xbf16, #tpu.memory_space<vmem>>, vector<8x32xbf16>
    %cst = arith.constant dense<0.000000e+00> : vector<512x32xf32>
    %2 = tpu.matmul %0, %1, %cst {dimension_numbers = #tpu.dot_dimension_numbers<[1], [0], [0], [1], [0, 0, 1, 1], [], []>} : vector<512x8xbf16>, vector<8x32xbf16>, vector<512x32xf32> -> vector<512x32xf32>
    %c0_3 = arith.constant 0 : index
    %c0_4 = arith.constant 0 : index
    %3 = vector.load %arg3[%c0_3, %c0_4] : memref<1x32xf32, #tpu.memory_space<vmem>>, vector<1x32xf32>
    %4 = vector.broadcast %3 : vector<1x32xf32> to vector<512x32xf32>
    %5 = arith.mulf %2, %4 : vector<512x32xf32>
    %c0_5 = arith.constant 0 : index
    %c0_6 = arith.constant 0 : index
    %6 = vector.load %arg4[%c0_5, %c0_6] : memref<1x32xf32, #tpu.memory_space<vmem>>, vector<1x32xf32>
    %7 = vector.broadcast %6 : vector<1x32xf32> to vector<512x32xf32>
    %8 = arith.addf %5, %7 : vector<512x32xf32>
    %cst_7 = arith.constant 0.000000e+00 : f32
    %9 = vector.broadcast %cst_7 : f32 to vector<512x32xf32>
    %10 = arith.maximumf %8, %9 : vector<512x32xf32>
    %c0_8 = arith.constant 0 : index
    %c0_9 = arith.constant 0 : index
    %11 = vector.load %arg5[%c0_8, %c0_9] : memref<512x32xf32, #tpu.memory_space<vmem>>, vector<512x32xf32>
    tpu.vector_store %arg5[%c0_8, %c0_9], %10 {strides = array<i32>} : memref<512x32xf32, #tpu.memory_space<vmem>>, vector<512x32xf32>,
    return
  }
  func.func @transform_0(%arg0: i32) -> (i32, i32) {
    %c0_i32 = arith.constant 0 : i32
    %c0_i32_0 = arith.constant 0 : i32
    return %arg0, %c0_i32 : i32, i32
  }
  func.func @transform_1(%arg0: i32) -> (i32, i32) {
    %c0_i32 = arith.constant 0 : i32
    %c0_i32_0 = arith.constant 0 : i32
    %c0_i32_1 = arith.constant 0 : i32
    return %c0_i32, %c0_i32_0 : i32, i32
  }
  func.func @transform_2(%arg0: i32) -> (i32, i32) {
    %c0_i32 = arith.constant 0 : i32
    %c0_i32_0 = arith.constant 0 : i32
    %c0_i32_1 = arith.constant 0 : i32
    return %c0_i32, %c0_i32_0 : i32, i32
  }
  func.func @transform_3(%arg0: i32) -> (i32, i32) {
    %c0_i32 = arith.constant 0 : i32
    %c0_i32_0 = arith.constant 0 : i32
    %c0_i32_1 = arith.constant 0 : i32
    return %c0_i32, %c0_i32_0 : i32, i32
  }
  func.func @transform_4(%arg0: i32) -> (i32, i32) {
    %c0_i32 = arith.constant 0 : i32
    %c0_i32_0 = arith.constant 0 : i32
    return %arg0, %c0_i32 : i32, i32
  }
}

</mosaic_0001>

<bundles_post_ra>
// kernel: tpu_custom_call.1
= control target key start
LH: loop header
LB: loop body
LE: loop exit
PB: predicated region body
PF: predicated region fallthrough
CT: control target
= control target key end

     0   :  { %vm340_vm0 = vcmask 1043456   ;;  %vm243_vm1 = vcmask 64512   ;;  %vm839_vm2 = vcmask 261120   ;;  %s1659_s1 = inlined_call_operand.vmem [shape: bf16[8,32], index: 1, kind: input, shape index: {}]   ;;  %s1660_s0 = inlined_call_operand.vmem [shape: bf16[512,8], index: 0, kind: input, shape index: {}]   ;;  %s1661_s2 = inlined_call_operand.vmem [shape: f32[1,32], index: 2, kind: input, shape index: {}]   ;;  %s1662_s3 = inlined_call_operand.vmem [shape: f32[1,32], index: 3, kind: input, shape index: {}]   ;;  %s1663_s4 = inlined_call_operand.vmem [shape: f32[512,32], index: 4, kind: output, shape index: {}]  }
   0x1   :  { %v82_v0 = vld [vmem:[%s1659_s1] sm:$0xf]  ;;  %v1079_v4 = vld [vmem:[%s1660_s0 + $0x8] sm:$0xff]   ;;  %v1081_v6 = vld [vmem:[%s1660_s0 + $0x10] sm:$0xff]  }
   0x2   :  { %1075 = vmatprep.subr.msk.bf16.mxu0 %vm340_vm0, %v82_v0  ;;  %1076 = vmatprep.subr.msk.bf16.mxu1 %vm340_vm0, %v82_v0  ;;  %v342_v1 = vsel %vm340_vm0, %v82_v0, 0  ;;  %v1077_v2 = vld [vmem:[%s1660_s0] sm:$0xff]   ;;  %v1080_v5 = vld [vmem:[%s1660_s0 + $0x88] sm:$0xff]   ;;  %v1082_v7 = vld [vmem:[%s1660_s0 + $0x90] sm:$0xff]  }
   0x3   :  { %1008 = vmatpush3.bf16.msra.mxu0 %v342_v1  ;;  %1074 = vmatpush3.bf16.msra.mxu1 %v342_v1  ;;  %v1078_v3 = vld [vmem:[%s1660_s0 + $0x80] sm:$0xff]   ;;  %v1083_v8 = vld [vmem:[%s1660_s0 + $0x18] sm:$0xff]   ;;  %v1087_v12 = vld [vmem:[%s1660_s0 + $0x28] sm:$0xff]  }
   0x4   :  { %1009 = vmatprep.mubr.msk.bf16.mxu0 %vm243_vm1, %v1077_v2  ;;  %1041 = vmatprep.mubr.msk.bf16.mxu1 %vm243_vm1, %v1078_v3  ;;  %v1084_v9 = vld [vmem:[%s1660_s0 + $0x98] sm:$0xff]   ;;  %v1085_v10 = vld [vmem:[%s1660_s0 + $0x20] sm:$0xff]   ;;  %v1088_v13 = vld [vmem:[%s1660_s0 + $0xa8] sm:$0xff]  }
   0x5   :  { %v1086_v11 = vld [vmem:[%s1660_s0 + $0xa0] sm:$0xff]   ;;  %v1089_v14 = vld [vmem:[%s1660_s0 + $0x30] sm:$0xff]   ;;  %v1091_v16 = vld [vmem:[%s1660_s0 + $0x38] sm:$0xff]  }
   0x6   :  { %1010 = vmatmul.mubr.msk.bf16.vlgmr.msra.gmra.mrb[0].mxu0 %vm243_vm1, %v1079_v4  ;;  %1042 = vmatmul.mubr.msk.bf16.vlgmr.msra.gmra.mrb[0].mxu1 %vm243_vm1, %v1080_v5  ;;  %v1090_v15 = vld [vmem:[%s1660_s0 + $0xb0] sm:$0xff]   ;;  %v1092_v17 = vld [vmem:[%s1660_s0 + $0xb8] sm:$0xff]   ;;  %v1093_v18 = vld [vmem:[%s1660_s0 + $0x40] sm:$0xff]  }
   0x7   :  { %1013 = vmatprep.mubr.msk.bf16.mxu0 %vm243_vm1, %v1081_v6  ;;  %1045 = vmatprep.mubr.msk.bf16.mxu1 %vm243_vm1, %v1082_v7  ;;  %v1094_v19 = vld [vmem:[%s1660_s0 + $0xc0] sm:$0xff]   ;;  %v1095_v20 = vld [vmem:[%s1660_s0 + $0x48] sm:$0xff]   ;;  %v1097_v22 = vld [vmem:[%s1660_s0 + $0x50] sm:$0xff]  }
   0x8   :  { %v1096_v21 = vld [vmem:[%s1660_s0 + $0xc8] sm:$0xff]   ;;  %v1098_v23 = vld [vmem:[%s1660_s0 + $0xd0] sm:$0xff]   ;;  %v1099_v24 = vld [vmem:[%s1660_s0 + $0x58] sm:$0xff]  }
   0x9   :  { %v1100_v25 = vld [vmem:[%s1660_s0 + $0xd8] sm:$0xff]   ;;  %v1101_v26 = vld [vmem:[%s1660_s0 + $0x60] sm:$0xff]   ;;  %v1103_v28 = vld [vmem:[%s1660_s0 + $0x68] sm:$0xff]  }
   0xa   :  { %v1102_v27 = vld [vmem:[%s1660_s0 + $0xe0] sm:$0xff]   ;;  %v1104_v29 = vld [vmem:[%s1660_s0 + $0xe8] sm:$0xff]   ;;  %v1105_v30 = vld [vmem:[%s1660_s0 + $0x70] sm:$0xff]  }
   0xb   :  { %v1106_v31 = vld [vmem:[%s1660_s0 + $0xf0] sm:$0xff]   ;;  %v1107_v32 = vld [vmem:[%s1660_s0 + $0x78] sm:$0xff]   ;;  %v1268_v34 = vld [vmem:[%s1661_s2] ss:$0 sm:$0xff] }
   0xc   :  { %v1108_v33 = vld [vmem:[%s1660_s0 + $0xf8] sm:$0xff]   ;;  %v1273_v36 = vld [vmem:[%s1662_s3] ss:$0 sm:$0xff] }
   0xe   :  { %1014 = vmatmul.mubr.msk.bf16.gmra.mrb[4].mxu0 %vm243_vm1, %v1083_v8  ;;  %1046 = vmatmul.mubr.msk.bf16.gmra.mrb[4].mxu1 %vm243_vm1, %v1084_v9 }
   0xf   :  { %1017 = vmatprep.mubr.msk.bf16.mxu0 %vm243_vm1, %v1085_v10  ;;  %1049 = vmatprep.mubr.msk.bf16.mxu1 %vm243_vm1, %v1086_v11 }
  0x16   :  { %1018 = vmatmul.mubr.msk.bf16.gmra.mrb[8].mxu0 %vm243_vm1, %v1087_v12  ;;  %1050 = vmatmul.mubr.msk.bf16.gmra.mrb[8].mxu1 %vm243_vm1, %v1088_v13 }
  0x17   :  { %1021 = vmatprep.mubr.msk.bf16.mxu0 %vm243_vm1, %v1089_v14  ;;  %1053 = vmatprep.mubr.msk.bf16.mxu1 %vm243_vm1, %v1090_v15 }
  0x1e   :  { %1022 = vmatmul.mubr.msk.bf16.gmra.mrb[12].mxu0 %vm243_vm1, %v1091_v16  ;;  %1054 = vmatmul.mubr.msk.bf16.gmra.mrb[12].mxu1 %vm243_vm1, %v1092_v17 }
  0x1f   :  { %1025 = vmatprep.mubr.msk.bf16.mxu0 %vm243_vm1, %v1093_v18  ;;  %1057 = vmatprep.mubr.msk.bf16.mxu1 %vm243_vm1, %v1094_v19 }
  0x26   :  { %1026 = vmatmul.mubr.msk.bf16.gmra.mrb[16].mxu0 %vm243_vm1, %v1095_v20  ;;  %1058 = vmatmul.mubr.msk.bf16.gmra.mrb[16].mxu1 %vm243_vm1, %v1096_v21 }
  0x27   :  { %1029 = vmatprep.mubr.msk.bf16.mxu0 %vm243_vm1, %v1097_v22  ;;  %1061 = vmatprep.mubr.msk.bf16.mxu1 %vm243_vm1, %v1098_v23 }
  0x2e   :  { %1030 = vmatmul.mubr.msk.bf16.gmra.mrb[20].mxu0 %vm243_vm1, %v1099_v24  ;;  %1062 = vmatmul.mubr.msk.bf16.gmra.mrb[20].mxu1 %vm243_vm1, %v1100_v25 }
  0x2f   :  { %1033 = vmatprep.mubr.msk.bf16.mxu0 %vm243_vm1, %v1101_v26  ;;  %1065 = vmatprep.mubr.msk.bf16.mxu1 %vm243_vm1, %v1102_v27 }
  0x36   :  { %1034 = vmatmul.mubr.msk.bf16.gmra.mrb[24].mxu0 %vm243_vm1, %v1103_v28  ;;  %1066 = vmatmul.mubr.msk.bf16.gmra.mrb[24].mxu1 %vm243_vm1, %v1104_v29 }
  0x37   :  { %1037 = vmatprep.mubr.msk.bf16.mxu0 %vm243_vm1, %v1105_v30  ;;  %1069 = vmatprep.mubr.msk.bf16.mxu1 %vm243_vm1, %v1106_v31 }
  0x3e   :  { %1038 = vmatmul.mubr.msk.bf16.gmra.mrb[28].mxu0 %vm243_vm1, %v1107_v32  ;;  %1070 = vmatmul.mubr.msk.bf16.gmra.mrb[28].mxu1 %vm243_vm1, %v1108_v33 }
  0xd9   :  { %v1011_v35 = vpop.f32.mrb[0].mxu0  ;;  %v1043_v38 = vpop.f32.mrb[0].mxu1 }
  0xda   :  { %v642_v37 = vmul.f32 %v1011_v35, %v1268_v34  ;;  %v378_v39 = vpop.f32.mrb[1].mxu0  ;;  %v674_v40 = vmul.f32 %v1043_v38, %v1268_v34  ;;  %v506_v42 = vpop.f32.mrb[1].mxu1 }
  0xdb   :  { %v640_v41 = vmul.f32 %v1268_v34, %v378_v39  ;;  %v1012_v43 = vpop.f32.mrb[2].mxu0  ;;  %v672_v45 = vmul.f32 %v1268_v34, %v506_v42  ;;  %v1044_v47 = vpop.f32.mrb[2].mxu1 }
  0xdc   :  { %v713_v44 = vadd.f32 %v1273_v36, %v642_v37  ;;  %v643_v46 = vmul.f32 %v1012_v43, %v1268_v34  ;;  %v381_v48 = vpop.f32.mrb[3].mxu0  ;;  %v745_v49 = vadd.f32 %v1273_v36, %v674_v40  ;;  %v675_v51 = vmul.f32 %v1044_v47, %v1268_v34  ;;  %v509_v53 = vpop.f32.mrb[3].mxu1 }
  0xdd   :  { %v711_v50 = vadd.f32 %v1273_v36, %v640_v41  ;;  %v641_v52 = vmul.f32 %v1268_v34, %v381_v48  ;;  %v743_v55 = vadd.f32 %v1273_v36, %v672_v45  ;;  %v673_v57 = vmul.f32 %v1268_v34, %v509_v53 }
  0xde   :  { %v777_v54 = vmax.f32 %v713_v44, 0.0  ;;  %v714_v56 = vadd.f32 %v1273_v36, %v643_v46  ;;  %v809_v58 = vmax.f32 %v745_v49, 0.0  ;;  %v746_v60 = vadd.f32 %v1273_v36, %v675_v51 }
  0xdf   :  { %v775_v59 = vmax.f32 %v711_v50, 0.0  ;;  %v712_v61 = vadd.f32 %v1273_v36, %v641_v52  ;;  %v807_v62 = vmax.f32 %v743_v55, 0.0  ;;  %v744_v0 = vadd.f32 %v1273_v36, %v673_v57 }
  0xe0   :  { %842 = vst.msk [vmem:[%s1663_s4 + $0x10] sm:$0xff] %vm839_vm2, %v777_v54  ;;  %v778_v63 = vmax.f32 %v714_v56, 0.0  ;;  %874 = vst.msk [vmem:[%s1663_s4 + $0x110] sm:$0xff] %vm839_vm2, %v809_v58  ;;  %v810_v1 = vmax.f32 %v746_v60, 0.0 }
  0xe1   :  { %840 = vst.msk [vmem:[%s1663_s4] sm:$0xff] %vm839_vm2, %v775_v59  ;;  %v776_v2 = vmax.f32 %v712_v61, 0.0  ;;  %v1015_v3 = vpop.f32.mrb[4].mxu0  ;;  %872 = vst.msk [vmem:[%s1663_s4 + $0x100] sm:$0xff] %vm839_vm2, %v807_v62  ;;  %v808_v4 = vmax.f32 %v744_v0, 0.0  ;;  %v1047_v6 = vpop.f32.mrb[4].mxu1 }
  0xe2   :  { %843 = vst.msk [vmem:[%s1663_s4 + $0x18] sm:$0xff] %vm839_vm2, %v778_v63  ;;  %v646_v5 = vmul.f32 %v1015_v3, %v1268_v34  ;;  %v394_v7 = vpop.f32.mrb[5].mxu0  ;;  %875 = vst.msk [vmem:[%s1663_s4 + $0x118] sm:$0xff] %vm839_vm2, %v810_v1  ;;  %v678_v8 = vmul.f32 %v1047_v6, %v1268_v34  ;;  %v522_v10 = vpop.f32.mrb[5].mxu1 }
  0xe3   :  { %841 = vst.msk [vmem:[%s1663_s4 + $0x8] sm:$0xff] %vm839_vm2, %v776_v2  ;;  %v644_v9 = vmul.f32 %v1268_v34, %v394_v7  ;;  %v1016_v11 = vpop.f32.mrb[6].mxu0  ;;  %873 = vst.msk [vmem:[%s1663_s4 + $0x108] sm:$0xff] %vm839_vm2, %v808_v4  ;;  %v676_v13 = vmul.f32 %v1268_v34, %v522_v10  ;;  %v1048_v15 = vpop.f32.mrb[6].mxu1 }
  0xe4   :  { %v717_v12 = vadd.f32 %v1273_v36, %v646_v5  ;;  %v647_v14 = vmul.f32 %v1016_v11, %v1268_v34  ;;  %v397_v16 = vpop.f32.mrb[7].mxu0  ;;  %v749_v17 = vadd.f32 %v1273_v36, %v678_v8  ;;  %v679_v19 = vmul.f32 %v1048_v15, %v1268_v34  ;;  %v525_v21 = vpop.f32.mrb[7].mxu1 }
  0xe5   :  { %v715_v18 = vadd.f32 %v1273_v36, %v644_v9  ;;  %v645_v20 = vmul.f32 %v1268_v34, %v397_v16  ;;  %v747_v23 = vadd.f32 %v1273_v36, %v676_v13  ;;  %v677_v25 = vmul.f32 %v1268_v34, %v525_v21 }
  0xe6   :  { %v781_v22 = vmax.f32 %v717_v12, 0.0  ;;  %v718_v24 = vadd.f32 %v1273_v36, %v647_v14  ;;  %v813_v26 = vmax.f32 %v749_v17, 0.0  ;;  %v750_v28 = vadd.f32 %v1273_v36, %v679_v19 }
  0xe7   :  { %v779_v27 = vmax.f32 %v715_v18, 0.0  ;;  %v716_v29 = vadd.f32 %v1273_v36, %v645_v20  ;;  %v811_v30 = vmax.f32 %v747_v23, 0.0  ;;  %v748_v32 = vadd.f32 %v1273_v36, %v677_v25 }
  0xe8   :  { %846 = vst.msk [vmem:[%s1663_s4 + $0x30] sm:$0xff] %vm839_vm2, %v781_v22  ;;  %v782_v31 = vmax.f32 %v718_v24, 0.0  ;;  %878 = vst.msk [vmem:[%s1663_s4 + $0x130] sm:$0xff] %vm839_vm2, %v813_v26  ;;  %v814_v33 = vmax.f32 %v750_v28, 0.0 }
  0xe9   :  { %844 = vst.msk [vmem:[%s1663_s4 + $0x20] sm:$0xff] %vm839_vm2, %v779_v27  ;;  %v780_v35 = vmax.f32 %v716_v29, 0.0  ;;  %v1019_v37 = vpop.f32.mrb[8].mxu0  ;;  %876 = vst.msk [vmem:[%s1663_s4 + $0x120] sm:$0xff] %vm839_vm2, %v811_v30  ;;  %v812_v38 = vmax.f32 %v748_v32, 0.0  ;;  %v1051_v40 = vpop.f32.mrb[8].mxu1 }
  0xea   :  { %847 = vst.msk [vmem:[%s1663_s4 + $0x38] sm:$0xff] %vm839_vm2, %v782_v31  ;;  %v650_v39 = vmul.f32 %v1019_v37, %v1268_v34  ;;  %v410_v41 = vpop.f32.mrb[9].mxu0  ;;  %879 = vst.msk [vmem:[%s1663_s4 + $0x138] sm:$0xff] %vm839_vm2, %v814_v33  ;;  %v682_v42 = vmul.f32 %v1051_v40, %v1268_v34  ;;  %v538_v44 = vpop.f32.mrb[9].mxu1 }
  0xeb   :  { %845 = vst.msk [vmem:[%s1663_s4 + $0x28] sm:$0xff] %vm839_vm2, %v780_v35  ;;  %v648_v43 = vmul.f32 %v1268_v34, %v410_v41  ;;  %v1020_v45 = vpop.f32.mrb[10].mxu0  ;;  %877 = vst.msk [vmem:[%s1663_s4 + $0x128] sm:$0xff] %vm839_vm2, %v812_v38  ;;  %v680_v47 = vmul.f32 %v1268_v34, %v538_v44  ;;  %v1052_v49 = vpop.f32.mrb[10].mxu1 }
  0xec   :  { %v721_v46 = vadd.f32 %v1273_v36, %v650_v39  ;;  %v651_v48 = vmul.f32 %v1020_v45, %v1268_v34  ;;  %v413_v50 = vpop.f32.mrb[11].mxu0  ;;  %v753_v51 = vadd.f32 %v1273_v36, %v682_v42  ;;  %v683_v53 = vmul.f32 %v1052_v49, %v1268_v34  ;;  %v541_v55 = vpop.f32.mrb[11].mxu1 }
  0xed   :  { %v719_v52 = vadd.f32 %v1273_v36, %v648_v43  ;;  %v649_v54 = vmul.f32 %v1268_v34, %v413_v50  ;;  %v751_v57 = vadd.f32 %v1273_v36, %v680_v47  ;;  %v681_v59 = vmul.f32 %v1268_v34, %v541_v55 }
  0xee   :  { %v785_v56 = vmax.f32 %v721_v46, 0.0  ;;  %v722_v58 = vadd.f32 %v1273_v36, %v651_v48  ;;  %v817_v60 = vmax.f32 %v753_v51, 0.0  ;;  %v754_v62 = vadd.f32 %v1273_v36, %v683_v53 }
  0xef   :  { %v783_v61 = vmax.f32 %v719_v52, 0.0  ;;  %v720_v63 = vadd.f32 %v1273_v36, %v649_v54  ;;  %v815_v0 = vmax.f32 %v751_v57, 0.0  ;;  %v752_v2 = vadd.f32 %v1273_v36, %v681_v59 }
  0xf0   :  { %850 = vst.msk [vmem:[%s1663_s4 + $0x50] sm:$0xff] %vm839_vm2, %v785_v56  ;;  %v786_v1 = vmax.f32 %v722_v58, 0.0  ;;  %882 = vst.msk [vmem:[%s1663_s4 + $0x150] sm:$0xff] %vm839_vm2, %v817_v60  ;;  %v818_v3 = vmax.f32 %v754_v62, 0.0 }
  0xf1   :  { %848 = vst.msk [vmem:[%s1663_s4 + $0x40] sm:$0xff] %vm839_vm2, %v783_v61  ;;  %v784_v4 = vmax.f32 %v720_v63, 0.0  ;;  %v1023_v5 = vpop.f32.mrb[12].mxu0  ;;  %880 = vst.msk [vmem:[%s1663_s4 + $0x140] sm:$0xff] %vm839_vm2, %v815_v0  ;;  %v816_v6 = vmax.f32 %v752_v2, 0.0  ;;  %v1055_v8 = vpop.f32.mrb[12].mxu1 }
  0xf2   :  { %851 = vst.msk [vmem:[%s1663_s4 + $0x58] sm:$0xff] %vm839_vm2, %v786_v1  ;;  %v654_v7 = vmul.f32 %v1023_v5, %v1268_v34  ;;  %v426_v9 = vpop.f32.mrb[13].mxu0  ;;  %883 = vst.msk [vmem:[%s1663_s4 + $0x158] sm:$0xff] %vm839_vm2, %v818_v3  ;;  %v686_v10 = vmul.f32 %v1055_v8, %v1268_v34  ;;  %v554_v12 = vpop.f32.mrb[13].mxu1 }
  0xf3   :  { %849 = vst.msk [vmem:[%s1663_s4 + $0x48] sm:$0xff] %vm839_vm2, %v784_v4  ;;  %v652_v11 = vmul.f32 %v1268_v34, %v426_v9  ;;  %v1024_v13 = vpop.f32.mrb[14].mxu0  ;;  %881 = vst.msk [vmem:[%s1663_s4 + $0x148] sm:$0xff] %vm839_vm2, %v816_v6  ;;  %v684_v15 = vmul.f32 %v1268_v34, %v554_v12  ;;  %v1056_v17 = vpop.f32.mrb[14].mxu1 }
  0xf4   :  { %v725_v14 = vadd.f32 %v1273_v36, %v654_v7  ;;  %v655_v16 = vmul.f32 %v1024_v13, %v1268_v34  ;;  %v429_v18 = vpop.f32.mrb[15].mxu0  ;;  %v757_v19 = vadd.f32 %v1273_v36, %v686_v10  ;;  %v687_v21 = vmul.f32 %v1056_v17, %v1268_v34  ;;  %v557_v23 = vpop.f32.mrb[15].mxu1 }
  0xf5   :  { %v723_v20 = vadd.f32 %v1273_v36, %v652_v11  ;;  %v653_v22 = vmul.f32 %v1268_v34, %v429_v18  ;;  %v755_v25 = vadd.f32 %v1273_v36, %v684_v15  ;;  %v685_v27 = vmul.f32 %v1268_v34, %v557_v23 }
  0xf6   :  { %v789_v24 = vmax.f32 %v725_v14, 0.0  ;;  %v726_v26 = vadd.f32 %v1273_v36, %v655_v16  ;;  %v821_v28 = vmax.f32 %v757_v19, 0.0  ;;  %v758_v30 = vadd.f32 %v1273_v36, %v687_v21 }
  0xf7   :  { %v787_v29 = vmax.f32 %v723_v20, 0.0  ;;  %v724_v31 = vadd.f32 %v1273_v36, %v653_v22  ;;  %v819_v32 = vmax.f32 %v755_v25, 0.0  ;;  %v756_v35 = vadd.f32 %v1273_v36, %v685_v27 }
  0xf8   :  { %854 = vst.msk [vmem:[%s1663_s4 + $0x70] sm:$0xff] %vm839_vm2, %v789_v24  ;;  %v790_v33 = vmax.f32 %v726_v26, 0.0  ;;  %886 = vst.msk [vmem:[%s1663_s4 + $0x170] sm:$0xff] %vm839_vm2, %v821_v28  ;;  %v822_v37 = vmax.f32 %v758_v30, 0.0 }
  0xf9   :  { %852 = vst.msk [vmem:[%s1663_s4 + $0x60] sm:$0xff] %vm839_vm2, %v787_v29  ;;  %v788_v38 = vmax.f32 %v724_v31, 0.0  ;;  %v1027_v39 = vpop.f32.mrb[16].mxu0  ;;  %884 = vst.msk [vmem:[%s1663_s4 + $0x160] sm:$0xff] %vm839_vm2, %v819_v32  ;;  %v820_v40 = vmax.f32 %v756_v35, 0.0  ;;  %v1059_v42 = vpop.f32.mrb[16].mxu1 }
  0xfa   :  { %855 = vst.msk [vmem:[%s1663_s4 + $0x78] sm:$0xff] %vm839_vm2, %v790_v33  ;;  %v658_v41 = vmul.f32 %v1027_v39, %v1268_v34  ;;  %v442_v43 = vpop.f32.mrb[17].mxu0  ;;  %887 = vst.msk [vmem:[%s1663_s4 + $0x178] sm:$0xff] %vm839_vm2, %v822_v37  ;;  %v690_v44 = vmul.f32 %v1059_v42, %v1268_v34  ;;  %v570_v46 = vpop.f32.mrb[17].mxu1 }
  0xfb   :  { %853 = vst.msk [vmem:[%s1663_s4 + $0x68] sm:$0xff] %vm839_vm2, %v788_v38  ;;  %v656_v45 = vmul.f32 %v1268_v34, %v442_v43  ;;  %v1028_v47 = vpop.f32.mrb[18].mxu0  ;;  %885 = vst.msk [vmem:[%s1663_s4 + $0x168] sm:$0xff] %vm839_vm2, %v820_v40  ;;  %v688_v49 = vmul.f32 %v1268_v34, %v570_v46  ;;  %v1060_v51 = vpop.f32.mrb[18].mxu1 }
  0xfc   :  { %v729_v48 = vadd.f32 %v1273_v36, %v658_v41  ;;  %v659_v50 = vmul.f32 %v1028_v47, %v1268_v34  ;;  %v445_v52 = vpop.f32.mrb[19].mxu0  ;;  %v761_v53 = vadd.f32 %v1273_v36, %v690_v44  ;;  %v691_v55 = vmul.f32 %v1060_v51, %v1268_v34  ;;  %v573_v57 = vpop.f32.mrb[19].mxu1 }
  0xfd   :  { %v727_v54 = vadd.f32 %v1273_v36, %v656_v45  ;;  %v657_v56 = vmul.f32 %v1268_v34, %v445_v52  ;;  %v759_v59 = vadd.f32 %v1273_v36, %v688_v49  ;;  %v689_v61 = vmul.f32 %v1268_v34, %v573_v57 }
  0xfe   :  { %v793_v58 = vmax.f32 %v729_v48, 0.0  ;;  %v730_v60 = vadd.f32 %v1273_v36, %v659_v50  ;;  %v825_v62 = vmax.f32 %v761_v53, 0.0  ;;  %v762_v0 = vadd.f32 %v1273_v36, %v691_v55 }
  0xff   :  { %v791_v63 = vmax.f32 %v727_v54, 0.0  ;;  %v728_v1 = vadd.f32 %v1273_v36, %v657_v56  ;;  %v823_v2 = vmax.f32 %v759_v59, 0.0  ;;  %v760_v4 = vadd.f32 %v1273_v36, %v689_v61 }
 0x100   :  { %858 = vst.msk [vmem:[%s1663_s4 + $0x90] sm:$0xff] %vm839_vm2, %v793_v58  ;;  %v794_v3 = vmax.f32 %v730_v60, 0.0  ;;  %890 = vst.msk [vmem:[%s1663_s4 + $0x190] sm:$0xff] %vm839_vm2, %v825_v62  ;;  %v826_v5 = vmax.f32 %v762_v0, 0.0 }
 0x101   :  { %856 = vst.msk [vmem:[%s1663_s4 + $0x80] sm:$0xff] %vm839_vm2, %v791_v63  ;;  %v792_v6 = vmax.f32 %v728_v1, 0.0  ;;  %v1031_v7 = vpop.f32.mrb[20].mxu0  ;;  %888 = vst.msk [vmem:[%s1663_s4 + $0x180] sm:$0xff] %vm839_vm2, %v823_v2  ;;  %v824_v8 = vmax.f32 %v760_v4, 0.0  ;;  %v1063_v10 = vpop.f32.mrb[20].mxu1 }
 0x102   :  { %859 = vst.msk [vmem:[%s1663_s4 + $0x98] sm:$0xff] %vm839_vm2, %v794_v3  ;;  %v662_v9 = vmul.f32 %v1031_v7, %v1268_v34  ;;  %v458_v11 = vpop.f32.mrb[21].mxu0  ;;  %891 = vst.msk [vmem:[%s1663_s4 + $0x198] sm:$0xff] %vm839_vm2, %v826_v5  ;;  %v694_v12 = vmul.f32 %v1063_v10, %v1268_v34  ;;  %v586_v14 = vpop.f32.mrb[21].mxu1 }
 0x103   :  { %857 = vst.msk [vmem:[%s1663_s4 + $0x88] sm:$0xff] %vm839_vm2, %v792_v6  ;;  %v660_v13 = vmul.f32 %v1268_v34, %v458_v11  ;;  %v1032_v15 = vpop.f32.mrb[22].mxu0  ;;  %889 = vst.msk [vmem:[%s1663_s4 + $0x188] sm:$0xff] %vm839_vm2, %v824_v8  ;;  %v692_v17 = vmul.f32 %v1268_v34, %v586_v14  ;;  %v1064_v19 = vpop.f32.mrb[22].mxu1 }
 0x104   :  { %v733_v16 = vadd.f32 %v1273_v36, %v662_v9  ;;  %v663_v18 = vmul.f32 %v1032_v15, %v1268_v34  ;;  %v461_v20 = vpop.f32.mrb[23].mxu0  ;;  %v765_v21 = vadd.f32 %v1273_v36, %v694_v12  ;;  %v695_v23 = vmul.f32 %v1064_v19, %v1268_v34  ;;  %v589_v25 = vpop.f32.mrb[23].mxu1 }
 0x105   :  { %v731_v22 = vadd.f32 %v1273_v36, %v660_v13  ;;  %v661_v24 = vmul.f32 %v1268_v34, %v461_v20  ;;  %v763_v27 = vadd.f32 %v1273_v36, %v692_v17  ;;  %v693_v29 = vmul.f32 %v1268_v34, %v589_v25 }
 0x106   :  { %v797_v26 = vmax.f32 %v733_v16, 0.0  ;;  %v734_v28 = vadd.f32 %v1273_v36, %v663_v18  ;;  %v829_v30 = vmax.f32 %v765_v21, 0.0  ;;  %v766_v32 = vadd.f32 %v1273_v36, %v695_v23 }
 0x107   :  { %v795_v31 = vmax.f32 %v731_v22, 0.0  ;;  %v732_v33 = vadd.f32 %v1273_v36, %v661_v24  ;;  %v827_v35 = vmax.f32 %v763_v27, 0.0  ;;  %v764_v38 = vadd.f32 %v1273_v36, %v693_v29 }
 0x108   :  { %862 = vst.msk [vmem:[%s1663_s4 + $0xb0] sm:$0xff] %vm839_vm2, %v797_v26  ;;  %v798_v37 = vmax.f32 %v734_v28, 0.0  ;;  %894 = vst.msk [vmem:[%s1663_s4 + $0x1b0] sm:$0xff] %vm839_vm2, %v829_v30  ;;  %v830_v39 = vmax.f32 %v766_v32, 0.0 }
 0x109   :  { %860 = vst.msk [vmem:[%s1663_s4 + $0xa0] sm:$0xff] %vm839_vm2, %v795_v31  ;;  %v796_v40 = vmax.f32 %v732_v33, 0.0  ;;  %v1035_v41 = vpop.f32.mrb[24].mxu0  ;;  %892 = vst.msk [vmem:[%s1663_s4 + $0x1a0] sm:$0xff] %vm839_vm2, %v827_v35  ;;  %v828_v42 = vmax.f32 %v764_v38, 0.0  ;;  %v1067_v44 = vpop.f32.mrb[24].mxu1 }
 0x10a   :  { %863 = vst.msk [vmem:[%s1663_s4 + $0xb8] sm:$0xff] %vm839_vm2, %v798_v37  ;;  %v666_v43 = vmul.f32 %v1035_v41, %v1268_v34  ;;  %v474_v45 = vpop.f32.mrb[25].mxu0  ;;  %895 = vst.msk [vmem:[%s1663_s4 + $0x1b8] sm:$0xff] %vm839_vm2, %v830_v39  ;;  %v698_v46 = vmul.f32 %v1067_v44, %v1268_v34  ;;  %v602_v48 = vpop.f32.mrb[25].mxu1 }
 0x10b   :  { %861 = vst.msk [vmem:[%s1663_s4 + $0xa8] sm:$0xff] %vm839_vm2, %v796_v40  ;;  %v664_v47 = vmul.f32 %v1268_v34, %v474_v45  ;;  %v1036_v49 = vpop.f32.mrb[26].mxu0  ;;  %893 = vst.msk [vmem:[%s1663_s4 + $0x1a8] sm:$0xff] %vm839_vm2, %v828_v42  ;;  %v696_v51 = vmul.f32 %v1268_v34, %v602_v48  ;;  %v1068_v53 = vpop.f32.mrb[26].mxu1 }
 0x10c   :  { %v737_v50 = vadd.f32 %v1273_v36, %v666_v43  ;;  %v667_v52 = vmul.f32 %v1036_v49, %v1268_v34  ;;  %v477_v54 = vpop.f32.mrb[27].mxu0  ;;  %v769_v55 = vadd.f32 %v1273_v36, %v698_v46  ;;  %v699_v57 = vmul.f32 %v1068_v53, %v1268_v34  ;;  %v605_v59 = vpop.f32.mrb[27].mxu1 }
 0x10d   :  { %v735_v56 = vadd.f32 %v1273_v36, %v664_v47  ;;  %v665_v58 = vmul.f32 %v1268_v34, %v477_v54  ;;  %v767_v61 = vadd.f32 %v1273_v36, %v696_v51  ;;  %v697_v63 = vmul.f32 %v1268_v34, %v605_v59 }
 0x10e   :  { %v801_v60 = vmax.f32 %v737_v50, 0.0  ;;  %v738_v62 = vadd.f32 %v1273_v36, %v667_v52  ;;  %v833_v0 = vmax.f32 %v769_v55, 0.0  ;;  %v770_v2 = vadd.f32 %v1273_v36, %v699_v57 }
 0x10f   :  { %v799_v1 = vmax.f32 %v735_v56, 0.0  ;;  %v736_v3 = vadd.f32 %v1273_v36, %v665_v58  ;;  %v831_v4 = vmax.f32 %v767_v61, 0.0  ;;  %v768_v6 = vadd.f32 %v1273_v36, %v697_v63 }
 0x110   :  { %866 = vst.msk [vmem:[%s1663_s4 + $0xd0] sm:$0xff] %vm839_vm2, %v801_v60  ;;  %v802_v5 = vmax.f32 %v738_v62, 0.0  ;;  %898 = vst.msk [vmem:[%s1663_s4 + $0x1d0] sm:$0xff] %vm839_vm2, %v833_v0  ;;  %v834_v7 = vmax.f32 %v770_v2, 0.0 }
 0x111   :  { %864 = vst.msk [vmem:[%s1663_s4 + $0xc0] sm:$0xff] %vm839_vm2, %v799_v1  ;;  %v800_v8 = vmax.f32 %v736_v3, 0.0  ;;  %v1039_v9 = vpop.f32.mrb[28].mxu0  ;;  %896 = vst.msk [vmem:[%s1663_s4 + $0x1c0] sm:$0xff] %vm839_vm2, %v831_v4  ;;  %v832_v10 = vmax.f32 %v768_v6, 0.0  ;;  %v1071_v12 = vpop.f32.mrb[28].mxu1 }
 0x112   :  { %867 = vst.msk [vmem:[%s1663_s4 + $0xd8] sm:$0xff] %vm839_vm2, %v802_v5  ;;  %v670_v11 = vmul.f32 %v1039_v9, %v1268_v34  ;;  %v490_v13 = vpop.f32.mrb[29].mxu0  ;;  %899 = vst.msk [vmem:[%s1663_s4 + $0x1d8] sm:$0xff] %vm839_vm2, %v834_v7  ;;  %v702_v14 = vmul.f32 %v1071_v12, %v1268_v34  ;;  %v618_v16 = vpop.f32.mrb[29].mxu1 }
 0x113   :  { %865 = vst.msk [vmem:[%s1663_s4 + $0xc8] sm:$0xff] %vm839_vm2, %v800_v8  ;;  %v668_v15 = vmul.f32 %v1268_v34, %v490_v13  ;;  %v1040_v17 = vpop.f32.mrb[30].mxu0  ;;  %897 = vst.msk [vmem:[%s1663_s4 + $0x1c8] sm:$0xff] %vm839_vm2, %v832_v10  ;;  %v700_v19 = vmul.f32 %v1268_v34, %v618_v16  ;;  %v1072_v21 = vpop.f32.mrb[30].mxu1 }
 0x114   :  { %v741_v18 = vadd.f32 %v1273_v36, %v670_v11  ;;  %v671_v20 = vmul.f32 %v1040_v17, %v1268_v34  ;;  %v493_v22 = vpop.f32.mrb[31].mxu0  ;;  %v773_v23 = vadd.f32 %v1273_v36, %v702_v14  ;;  %v703_v25 = vmul.f32 %v1072_v21, %v1268_v34  ;;  %v621_v27 = vpop.f32.mrb[31].mxu1 }
 0x115   :  { %v739_v24 = vadd.f32 %v1273_v36, %v668_v15  ;;  %v669_v26 = vmul.f32 %v1268_v34, %v493_v22  ;;  %v771_v29 = vadd.f32 %v1273_v36, %v700_v19  ;;  %v701_v31 = vmul.f32 %v1268_v34, %v621_v27 }
 0x116   :  { %v805_v28 = vmax.f32 %v741_v18, 0.0  ;;  %v742_v30 = vadd.f32 %v1273_v36, %v671_v20  ;;  %v837_v32 = vmax.f32 %v773_v23, 0.0  ;;  %v774_v35 = vadd.f32 %v1273_v36, %v703_v25 }
 0x117   :  { %v803_v33 = vmax.f32 %v739_v24, 0.0  ;;  %v740_v37 = vadd.f32 %v1273_v36, %v669_v26  ;;  %v835_v38 = vmax.f32 %v771_v29, 0.0  ;;  %v772_v40 = vadd.f32 %v1273_v36, %v701_v31 }
 0x118   :  { %870 = vst.msk [vmem:[%s1663_s4 + $0xf0] sm:$0xff] %vm839_vm2, %v805_v28  ;;  %v806_v39 = vmax.f32 %v742_v30, 0.0  ;;  %902 = vst.msk [vmem:[%s1663_s4 + $0x1f0] sm:$0xff] %vm839_vm2, %v837_v32  ;;  %v838_v34 = vmax.f32 %v774_v35, 0.0 }
 0x119   :  { %868 = vst.msk [vmem:[%s1663_s4 + $0xe0] sm:$0xff] %vm839_vm2, %v803_v33  ;;  %v804_v41 = vmax.f32 %v740_v37, 0.0  ;;  %900 = vst.msk [vmem:[%s1663_s4 + $0x1e0] sm:$0xff] %vm839_vm2, %v835_v38  ;;  %v836_v36 = vmax.f32 %v772_v40, 0.0 }
 0x11a   :  { %871 = vst.msk [vmem:[%s1663_s4 + $0xf8] sm:$0xff] %vm839_vm2, %v806_v39  ;;  %903 = vst.msk [vmem:[%s1663_s4 + $0x1f8] sm:$0xff] %vm839_vm2, %v838_v34 }
 0x11b   :  { %869 = vst.msk [vmem:[%s1663_s4 + $0xe8] sm:$0xff] %vm839_vm2, %v804_v41  ;;  %901 = vst.msk [vmem:[%s1663_s4 + $0x1e8] sm:$0xff] %vm839_vm2, %v836_v36 }

</bundles_post_ra>
